<compile_context>
chip_gen: v7x
topology: tpu7x:2x2x1
jax: 0.10.0
libtpu: 0.0.40
codegen_flags: <defaults>
</compile_context>

<pallas_src>
import functools

import jax
import jax.numpy as jnp
from jax.experimental import pallas as pl
from jax.experimental.pallas import tpu as pltpu


def _round_up(n, m):
    return ((n + m - 1) // m) * m


def _pad2(a, rows, cols):
    """Zero-pad a 2D array up to (rows, cols)."""
    if a.shape == (rows, cols):
        return a
    return jnp.zeros((rows, cols), a.dtype).at[: a.shape[0], : a.shape[1]].set(a)


def _hidden_tanh_dtype():
    """bf16 tanh on chips with a bf16 EUP (v6e/v7x); f32 elsewhere."""
    try:
        kind = jax.devices()[0].device_kind.lower()
    except Exception:  # pragma: no cover - defensive
        return jnp.float32
    old = any(t in kind for t in ("v2", "v3", "v4", "v5"))
    return jnp.float32 if old else jnp.bfloat16


def _choose_tb(B, tile_o):
    """Batch-tile rows per grid step."""
    if B <= 8:
        return 8
    # Bigger rows/step when the fc3 output tile is small (cheap steps).
    cap = 512 if tile_o <= 512 else 256
    if B <= 2 * cap:
        # Exactly two grid steps -> both v7x TensorCores busy, minimal padding.
        return _round_up((B + 1) // 2, 8)
    # Large batch: pick the candidate minimizing padded rows (ties -> larger tile).
    cands = [c for c in (512, 448, 384, 320, 256, 192, 128, 96, 64) if c <= cap]
    return min(cands, key=lambda t: (_round_up(B, t) - B, -t))


def _v2i_kernel(x_ref, w1_ref, b1_ref, w2_ref, b2_ref, w3_ref, b3_ref, o_ref,
                h2_ref, *, tanh_dtype):
    # Grid = (batch tile i, fc3 output-column tile j).  fc1/fc2 depend only on i,
    # so compute them once per batch tile (j == 0) and cache h2 (bf16) in VMEM.
    @pl.when(pl.program_id(1) == 0)
    def _():
        h1 = (jnp.dot(x_ref[...].astype(jnp.bfloat16), w1_ref[...],
                      preferred_element_type=jnp.float32) + b1_ref[...])
        h1 = jnp.tanh(h1.astype(tanh_dtype)).astype(jnp.bfloat16)
        h2 = (jnp.dot(h1, w2_ref[...],
                      preferred_element_type=jnp.float32) + b2_ref[...])
        h2_ref[...] = jnp.tanh(h2.astype(tanh_dtype)).astype(jnp.bfloat16)

    # fc3 tile: bf16 MXU inputs, f32 accumulate + bias + tanh, f32 store.
    o_ref[...] = jnp.tanh(
        jnp.dot(h2_ref[...], w3_ref[...], preferred_element_type=jnp.float32)
        + b3_ref[...]
    ).astype(o_ref.dtype)


def prepare_params(params, *, max_out_tile=2048):
    """One-time padding + bf16 cast of the Linear params.

    Do this ONCE (not per forward call): padded weight rows/cols and biases are
    zero, so results are numerically identical to the unpadded computation
    (tanh(0)=0 feeds zero weight rows downstream; padded outputs are discarded).
    """
    w1, b1, w2, b2, w3, b3 = params
    V, H1 = w1.shape
    H2 = w2.shape[1]
    O = w3.shape[1]

    V_pad = _round_up(V, 128)
    H1_pad = _round_up(H1, 128)   # 200 -> 256
    H2_pad = _round_up(H2, 128)   # 500 -> 512

    # fc3 output-dim tiling: num_j tiles of width TO (lane-dense, <= max_out_tile).
    O_lane = _round_up(O, 128)
    num_j = pl.cdiv(O_lane, max_out_tile)
    TO = _round_up(pl.cdiv(O_lane, num_j), 128)
    O_pad = num_j * TO

    return {
        "w1": _pad2(w1, V_pad, H1_pad).astype(jnp.bfloat16),
        "b1": _pad2(b1, 1, H1_pad),
        "w2": _pad2(w2, H1_pad, H2_pad).astype(jnp.bfloat16),
        "b2": _pad2(b2, 1, H2_pad),
        "w3": _pad2(w3, H2_pad, O_pad).astype(jnp.bfloat16),
        "b3": _pad2(b3, 1, O_pad),
        "dims": (V, O, V_pad, H1_pad, H2_pad, O_pad, TO),
    }


def vector_to_image_net(x, prepped, image_size):
    """Forward pass. Returns (B, 1, image_size, image_size) float32."""
    V_in, out_dim, V_pad, H1_pad, H2_pad, O_pad, TO = prepped["dims"]
    B, V = x.shape
    assert V == V_in, (V, V_in)
    assert out_dim == image_size * image_size, (out_dim, image_size)

    num_j = O_pad // TO
    TB = _choose_tb(B, TO)
    B_pad = _round_up(B, TB)
    num_i = B_pad // TB

    # Only x (tiny) may need per-call padding; weights were padded in prepare_params.
    xp = x if (B_pad == B and V_pad == V) else _pad2(x, B_pad, V_pad)

    kernel = functools.partial(_v2i_kernel, tanh_dtype=_hidden_tanh_dtype())

    # Resident (grid-invariant) blocks: fetched once, single-buffered.
    def resident(a):
        return pl.BlockSpec(a.shape, lambda i, j: (0, 0),
                            pipeline_mode=pl.Buffered(1))

    # Explicit scoped-VMEM budget (v5e defaults to 16 MiB which is too small at
    # larger image_size): actual buffers + slack for kernel temporaries.
    vmem_bytes = (
        2 * TB * V_pad * 4                       # x tile, double-buffered, f32
        + 2 * TB * TO * 4                        # out tile, double-buffered, f32
        + 2 * (H2_pad * TO * 2 + TO * 4)         # w3/b3 tiles, double-buffered
        + (V_pad * H1_pad + H1_pad * H2_pad) * 2 # resident w1/w2 (bf16, 1 buffer)
        + (H1_pad + H2_pad) * 4                  # resident b1/b2 (f32, 1 buffer)
        + TB * H2_pad * 2                        # h2 scratch (bf16)
    )
    vmem_limit = int(max(32 << 20, min(2 * vmem_bytes + (4 << 20), 64 << 20)))

    out2d = pl.pallas_call(
        kernel,
        out_shape=jax.ShapeDtypeStruct((B_pad, O_pad), jnp.float32),
        grid=(num_i, num_j),
        in_specs=[
            pl.BlockSpec((TB, V_pad), lambda i, j: (i, 0)),    # x batch tile
            resident(prepped["w1"]), resident(prepped["b1"]),
            resident(prepped["w2"]), resident(prepped["b2"]),
            pl.BlockSpec((H2_pad, TO), lambda i, j: (0, j)),   # w3 output-column tile
            pl.BlockSpec((1, TO), lambda i, j: (0, j)),        # b3 tile
        ],
        out_specs=pl.BlockSpec((TB, TO), lambda i, j: (i, j)),
        scratch_shapes=[pltpu.VMEM((TB, H2_pad), jnp.bfloat16)],  # h2 cache across j
        compiler_params=pltpu.CompilerParams(
            dimension_semantics=("parallel", "arbitrary"),  # batch over cores, fc3 tiles sequential
            vmem_limit_bytes=vmem_limit,
        ),
    )(xp, prepped["w1"], prepped["b1"], prepped["w2"], prepped["b2"],
      prepped["w3"], prepped["b3"])

    # Drop padding only if it exists (avoids a full output copy when shapes align),
    # then torch: x.view(-1, 1, image_size, image_size).
    out = out2d
    if O_pad != out_dim:
        out = out[:, :out_dim]
    if B_pad != B:
        out = out[:B]
    return out.reshape(B, 1, image_size, image_size)


def init_params(key, vector_size, image_size):
    """Deterministic init mirroring nn.Linear default (U[-1/sqrt(fan_in), +1/sqrt(fan_in)]).
    Weights stored as (in_features, out_features) = PyTorch weight transposed."""
    dims = [(vector_size, 200), (200, 500), (500, image_size * image_size)]
    params = []
    for (fan_in, fan_out) in dims:
        key, kw, kb = jax.random.split(key, 3)
        bound = 1.0 / (fan_in ** 0.5)
        w = jax.random.uniform(kw, (fan_in, fan_out), jnp.float32, -bound, bound)
        b = jax.random.uniform(kb, (1, fan_out), jnp.float32, -bound, bound)
        params += [w, b]
    return tuple(params)


def _reference(x, params):
    """Pure f32 reference (torch semantics)."""
    w1, b1, w2, b2, w3, b3 = params
    h = jnp.tanh(x @ w1 + b1)
    h = jnp.tanh(h @ w2 + b2)
    return jnp.tanh(h @ w3 + b3)


if __name__ == "__main__":
    # Small shapes consistent with the module's forward.
    batch = 2
    vector_size = 32
    image_size = 16  # fc3 output = 16*16 = 256

    key = jax.random.PRNGKey(0)
    key, kx = jax.random.split(key)
    x = jax.random.normal(kx, (batch, vector_size), jnp.float32)

    params = init_params(key, vector_size, image_size)
    prepped = prepare_params(params)          # one-time param prep (hoisted)

    out = vector_to_image_net(x, prepped, image_size)
    out = jax.block_until_ready(out)

    assert out.shape == (batch, 1, image_size, image_size), out.shape

    ref = _reference(x, params).reshape(batch, 1, image_size, image_size)
    ref = jax.block_until_ready(ref)
    # bf16 matmul inputs / bf16 hidden tanh (f32 accumulate) -> loosened tolerance.
    assert jnp.allclose(out, ref, atol=7e-2, rtol=0.0), "mismatch vs reference"

    print("KERNEL_OK")
</pallas_src>

<mosaic_0001>
module attributes {stable_mosaic.version = 11 : i64} {
  func.func @_v2i_kernel(%arg0: i32, %arg1: i32, %arg2: memref<8x128xf32, #tpu.memory_space<vmem>>, %arg3: memref<128x256xbf16, #tpu.memory_space<vmem>>, %arg4: memref<1x256xf32, #tpu.memory_space<vmem>>, %arg5: memref<256x512xbf16, #tpu.memory_space<vmem>>, %arg6: memref<1x512xf32, #tpu.memory_space<vmem>>, %arg7: memref<512x256xbf16, #tpu.memory_space<vmem>>, %arg8: memref<1x256xf32, #tpu.memory_space<vmem>>, %arg9: memref<8x256xf32, #tpu.memory_space<vmem>>, %arg10: memref<8x512xbf16, #tpu.memory_space<vmem>>) attributes {dimension_semantics = [#tpu.dimension_semantics<parallel>, #tpu.dimension_semantics<arbitrary>], iteration_bounds = array<i64: 1, 1>, scalar_prefetch = 0 : i64, scratch_operands = 1 : i64, tpu.core_type = #tpu.core_type<tc>, window_params = [{transform_indices = @transform_0, window_bounds = array<i64: 8, 128>}, {pipeline_mode = #tpu.pipeline_mode<synchronous>, transform_indices = @transform_1, window_bounds = array<i64: 128, 256>}, {pipeline_mode = #tpu.pipeline_mode<synchronous>, transform_indices = @transform_2, window_bounds = array<i64: 1, 256>}, {pipeline_mode = #tpu.pipeline_mode<synchronous>, transform_indices = @transform_3, window_bounds = array<i64: 256, 512>}, {pipeline_mode = #tpu.pipeline_mode<synchronous>, transform_indices = @transform_4, window_bounds = array<i64: 1, 512>}, {transform_indices = @transform_5, window_bounds = array<i64: 512, 256>}, {transform_indices = @transform_6, window_bounds = array<i64: 1, 256>}, {transform_indices = @transform_7, window_bounds = array<i64: 8, 256>}]} {
    %c0_i32 = arith.constant 0 : i32
    %0 = arith.cmpi eq, %arg1, %c0_i32 : i32
    %1 = arith.extui %0 : i1 to i32
    %c0_i32_0 = arith.constant 0 : i32
    %2 = arith.cmpi ne, %1, %c0_i32_0 : i32
    scf.if %2 {
      %c0_8 = arith.constant 0 : index
      %c0_9 = arith.constant 0 : index
      %11 = vector.load %arg2[%c0_8, %c0_9] : memref<8x128xf32, #tpu.memory_space<vmem>>, vector<8x128xf32>
      %12 = arith.truncf %11 : vector<8x128xf32> to vector<8x128xbf16>
      %c0_10 = arith.constant 0 : index
      %c0_11 = arith.constant 0 : index
      %13 = vector.load %arg3[%c0_10, %c0_11] : memref<128x256xbf16, #tpu.memory_space<vmem>>, vector<128x256xbf16>
      %cst_12 = arith.constant dense<0.000000e+00> : vector<8x256xf32>
      %14 = tpu.matmul %12, %13, %cst_12 {dimension_numbers = #tpu.dot_dimension_numbers<[1], [0], [0], [1], [0, 0, 1, 1], [], []>} : vector<8x128xbf16>, vector<128x256xbf16>, vector<8x256xf32> -> vector<8x256xf32>
      %c0_13 = arith.constant 0 : index
      %c0_14 = arith.constant 0 : index
      %15 = vector.load %arg4[%c0_13, %c0_14] : memref<1x256xf32, #tpu.memory_space<vmem>>, vector<1x256xf32>
      %16 = vector.broadcast %15 : vector<1x256xf32> to vector<8x256xf32>
      %17 = arith.addf %14, %16 : vector<8x256xf32>
      %18 = arith.truncf %17 : vector<8x256xf32> to vector<8x256xbf16>
      %19 = math.tanh %18 : vector<8x256xbf16>
      %c0_15 = arith.constant 0 : index
      %c0_16 = arith.constant 0 : index
      %20 = vector.load %arg5[%c0_15, %c0_16] : memref<256x512xbf16, #tpu.memory_space<vmem>>, vector<256x512xbf16>
      %cst_17 = arith.constant dense<0.000000e+00> : vector<8x512xf32>
      %21 = tpu.matmul %19, %20, %cst_17 {dimension_numbers = #tpu.dot_dimension_numbers<[1], [0], [0], [1], [0, 0, 1, 1], [], []>} : vector<8x256xbf16>, vector<256x512xbf16>, vector<8x512xf32> -> vector<8x512xf32>
      %c0_18 = arith.constant 0 : index
      %c0_19 = arith.constant 0 : index
      %22 = vector.load %arg6[%c0_18, %c0_19] : memref<1x512xf32, #tpu.memory_space<vmem>>, vector<1x512xf32>
      %23 = vector.broadcast %22 : vector<1x512xf32> to vector<8x512xf32>
      %24 = arith.addf %21, %23 : vector<8x512xf32>
      %25 = arith.truncf %24 : vector<8x512xf32> to vector<8x512xbf16>
      %26 = math.tanh %25 : vector<8x512xbf16>
      %c0_20 = arith.constant 0 : index
      %c0_21 = arith.constant 0 : index
      %27 = vector.load %arg10[%c0_20, %c0_21] : memref<8x512xbf16, #tpu.memory_space<vmem>>, vector<8x512xbf16>
      tpu.vector_store %arg10[%c0_20, %c0_21], %26 {strides = array<i32>} : memref<8x512xbf16, #tpu.memory_space<vmem>>, vector<8x512xbf16>,
    } else {
    }
    %c0 = arith.constant 0 : index
    %c0_1 = arith.constant 0 : index
    %3 = vector.load %arg10[%c0, %c0_1] : memref<8x512xbf16, #tpu.memory_space<vmem>>, vector<8x512xbf16>
    %c0_2 = arith.constant 0 : index
    %c0_3 = arith.constant 0 : index
    %4 = vector.load %arg7[%c0_2, %c0_3] : memref<512x256xbf16, #tpu.memory_space<vmem>>, vector<512x256xbf16>
    %cst = arith.constant dense<0.000000e+00> : vector<8x256xf32>
    %5 = tpu.matmul %3, %4, %cst {dimension_numbers = #tpu.dot_dimension_numbers<[1], [0], [0], [1], [0, 0, 1, 1], [], []>} : vector<8x512xbf16>, vector<512x256xbf16>, vector<8x256xf32> -> vector<8x256xf32>
    %c0_4 = arith.constant 0 : index
    %c0_5 = arith.constant 0 : index
    %6 = vector.load %arg8[%c0_4, %c0_5] : memref<1x256xf32, #tpu.memory_space<vmem>>, vector<1x256xf32>
    %7 = vector.broadcast %6 : vector<1x256xf32> to vector<8x256xf32>
    %8 = arith.addf %5, %7 : vector<8x256xf32>
    %9 = math.tanh %8 : vector<8x256xf32>
    %c0_6 = arith.constant 0 : index
    %c0_7 = arith.constant 0 : index
    %10 = vector.load %arg9[%c0_6, %c0_7] : memref<8x256xf32, #tpu.memory_space<vmem>>, vector<8x256xf32>
    tpu.vector_store %arg9[%c0_6, %c0_7], %9 {strides = array<i32>} : memref<8x256xf32, #tpu.memory_space<vmem>>, vector<8x256xf32>,
    return
  }
  func.func @transform_0(%arg0: i32, %arg1: i32) -> (i32, i32) {
    %c0_i32 = arith.constant 0 : i32
    %c0_i32_0 = arith.constant 0 : i32
    return %arg0, %c0_i32 : i32, i32
  }
  func.func @transform_1(%arg0: i32, %arg1: i32) -> (i32, i32) {
    %c0_i32 = arith.constant 0 : i32
    %c0_i32_0 = arith.constant 0 : i32
    %c0_i32_1 = arith.constant 0 : i32
    return %c0_i32, %c0_i32_0 : i32, i32
  }
  func.func @transform_2(%arg0: i32, %arg1: i32) -> (i32, i32) {
    %c0_i32 = arith.constant 0 : i32
    %c0_i32_0 = arith.constant 0 : i32
    %c0_i32_1 = arith.constant 0 : i32
    return %c0_i32, %c0_i32_0 : i32, i32
  }
  func.func @transform_3(%arg0: i32, %arg1: i32) -> (i32, i32) {
    %c0_i32 = arith.constant 0 : i32
    %c0_i32_0 = arith.constant 0 : i32
    %c0_i32_1 = arith.constant 0 : i32
    return %c0_i32, %c0_i32_0 : i32, i32
  }
  func.func @transform_4(%arg0: i32, %arg1: i32) -> (i32, i32) {
    %c0_i32 = arith.constant 0 : i32
    %c0_i32_0 = arith.constant 0 : i32
    %c0_i32_1 = arith.constant 0 : i32
    return %c0_i32, %c0_i32_0 : i32, i32
  }
  func.func @transform_5(%arg0: i32, %arg1: i32) -> (i32, i32) {
    %c0_i32 = arith.constant 0 : i32
    %c0_i32_0 = arith.constant 0 : i32
    return %c0_i32, %arg1 : i32, i32
  }
  func.func @transform_6(%arg0: i32, %arg1: i32) -> (i32, i32) {
    %c0_i32 = arith.constant 0 : i32
    %c0_i32_0 = arith.constant 0 : i32
    return %c0_i32, %arg1 : i32, i32
  }
  func.func @transform_7(%arg0: i32, %arg1: i32) -> (i32, i32) {
    %c0_i32 = arith.constant 0 : i32
    return %arg0, %arg1 : i32, i32
  }
}

</mosaic_0001>

<bundles_post_ra>
// kernel: tpu_custom_call.1
= control target key start
LH: loop header
LB: loop body
LE: loop exit
PB: predicated region body
PF: predicated region fallthrough
CT: control target
= control target key end

     0   :  { %12 = vsyncpa [#allocation4], 0  ;;  %s1936_s0 = inlined_call_operand.hbm [shape: f32[8,128], index: 0, kind: input, shape index: {}]   ;;  %s1937_s1 = inlined_call_operand.hbm [shape: bf16[128,256], index: 1, kind: input, shape index: {}]   ;;  %s1938_s2 = inlined_call_operand.vmem [shape: f32[1,256], index: 2, kind: input, shape index: {}]   ;;  %s1939_s3 = inlined_call_operand.hbm [shape: bf16[256,512], index: 3, kind: input, shape index: {}]   ;;  %s1940_s4 = inlined_call_operand.vmem [shape: f32[1,512], index: 4, kind: input, shape index: {}]   ;;  %s1941_s5 = inlined_call_operand.hbm [shape: bf16[512,256], index: 5, kind: input, shape index: {}]   ;;  %s1942_s6 = inlined_call_operand.vmem [shape: f32[1,256], index: 6, kind: input, shape index: {}]   ;;  %s1943_s7 = inlined_call_operand.hbm [shape: f32[8,256], index: 7, kind: output, shape index: {}]  }
   0x1   :  { %13 = vsyncpa [#allocation7], 0 }
   0x2   :  { %14 = vsyncpa [#allocation10], 0 }
   0x3   :  { %15 = vsyncpa [#allocation5], 0  ;;  %s1785_s24 = smov [#allocation6]   ;;  %s1667_s28 = scalar_lea.hbm %s1937_s1, 2048 }
   0x4   :  { %s31_s25 = sshll.u32 %s1785_s24, 4  ;;  %p1668_p0 = scmp.ne.s32.totalorder %s1937_s1, %s1667_s28  ;;  %s32_s25 = int_to_ptr.vmem [resolvable:$true] %s31_s25 }
   0x5   :  { %p1671_p1 = scmp.lt.u32.totalorder %s1667_s28, %s1937_s1 }
   0x7   :  { %p1673_p2 = pnand %p1671_p1, %p1668_p0 }
   0x9   :  { %1676 = shalt.err (!%p1673_p2)
}
   0xa   :  { %s1677_s10 = scalar_lea.vmem %s32_s25, 2048  ;;  %p1682_p4 = scmp.lt.s32.totalorder %s32_s25, %s32_s25 }
   0xb   :  { %p1678_p3 = scmp.ne.s32.totalorder %s32_s25, %s1677_s10  ;;  %p1683_p5 = scmp.lt.s32.totalorder %s1677_s10, %s1677_s10 }
   0xd   :  { %p1684_p6 = por %p1683_p5, %p1682_p4 }
   0xf   :  { %p1685_p7 = pnand %p1684_p6, %p1678_p3 }
  0x11   :  { %1688 = shalt.err (!%p1685_p7)
}
  0x12   :  { %s1786_s11 = smov 128   ;;  %s1787_s12 = smov 8  }
  0x13   :  { %37 = dma.hbm_to_vmem [thread:$0]  %s1937_s1, 2048, %s32_s25, [#allocation7], %s1786_s11, %s1786_s11, %s1787_s12  }
  0x14   :  { %s1788_s15 = smov [#allocation3]   ;;  %s1789_s17 = smov [#allocation8]  }
  0x15   :  { %s22_s16 = sshll.u32 %s1788_s15, 4  ;;  %s45_s18 = sshll.u32 %s1789_s17, 4  ;;  %s23_s16 = int_to_ptr.vmem [resolvable:$true] %s22_s16  ;;  %s46_s18 = int_to_ptr.vmem [resolvable:$true] %s45_s18 }
  0x16   :  { %s1689_s21 = scalar_lea.hbm %s1936_s0, 128 }
  0x17   :  { %p1690_p8 = scmp.ne.s32.totalorder %s1936_s0, %s1689_s21  ;;  %p1693_p9 = scmp.lt.u32.totalorder %s1689_s21, %s1936_s0 }
  0x19   :  { %p1695_p10 = pnand %p1693_p9, %p1690_p8 }
  0x1b   :  { %1698 = shalt.err (!%p1695_p10)
}
  0x1c   :  { %s1699_s1 = scalar_lea.vmem %s23_s16, 128  ;;  %p1704_p12 = scmp.lt.s32.totalorder %s23_s16, %s23_s16 }
  0x1d   :  { %p1700_p11 = scmp.ne.s32.totalorder %s23_s16, %s1699_s1  ;;  %p1705_p13 = scmp.lt.s32.totalorder %s1699_s1, %s1699_s1 }
  0x1f   :  { %p1706_p0 = por %p1705_p13, %p1704_p12 }
  0x21   :  { %p1707_p1 = pnand %p1706_p0, %p1700_p11 }
  0x23   :  { %1710 = shalt.err (!%p1707_p1)
}
  0x24   :  { %25 = dma.hbm_to_vmem [thread:$0]  %s1936_s0, 128, %s23_s16, [#allocation4]  }
  0x25   :  { %s1711_s30 = scalar_lea.hbm %s1939_s3, 8192 }
  0x26   :  { %p1712_p2 = scmp.ne.s32.totalorder %s1939_s3, %s1711_s30  ;;  %p1715_p3 = scmp.lt.u32.totalorder %s1711_s30, %s1939_s3 }
  0x28   :  { %p1717_p4 = pnand %p1715_p3, %p1712_p2 }
  0x2a   :  { %1720 = shalt.err (!%p1717_p4)
}
  0x2b   :  { %s1721_s14 = scalar_lea.vmem %s46_s18, 8192  ;;  %p1726_p6 = scmp.lt.s32.totalorder %s46_s18, %s46_s18 }
  0x2c   :  { %p1722_p5 = scmp.ne.s32.totalorder %s46_s18, %s1721_s14  ;;  %p1727_p7 = scmp.lt.s32.totalorder %s1721_s14, %s1721_s14 }
  0x2e   :  { %p1728_p8 = por %p1727_p7, %p1726_p6 }
  0x30   :  { %p1729_p9 = pnand %p1728_p8, %p1722_p5 }
  0x32   :  { %1732 = shalt.err (!%p1729_p9)
}
  0x33   :  { %s1790_s0 = smov 256   ;;  %s1791_s15 = smov 16  }
  0x34   :  { %51 = dma.hbm_to_vmem [thread:$0]  %s1939_s3, 8192, %s46_s18, [#allocation7], %s1790_s0, %s1790_s0, %s1791_s15  }
  0x35   :  { %s1792_s19 = smov [#allocation9]   ;;  %s1733_s23 = scalar_lea.hbm %s1941_s5, 8192 }
  0x36   :  { %s59_s20 = sshll.u32 %s1792_s19, 4  ;;  %p1734_p10 = scmp.ne.s32.totalorder %s1941_s5, %s1733_s23  ;;  %s60_s20 = int_to_ptr.vmem [resolvable:$true] %s59_s20 }
  0x37   :  { %p1737_p11 = scmp.lt.u32.totalorder %s1733_s23, %s1941_s5 }
  0x39   :  { %p1739_p12 = pnand %p1737_p11, %p1734_p10 }
  0x3b   :  { %1742 = shalt.err (!%p1739_p12)
}
  0x3c   :  { %s1743_s27 = scalar_lea.vmem %s60_s20, 8192  ;;  %p1748_p0 = scmp.lt.s32.totalorder %s60_s20, %s60_s20 }
  0x3d   :  { %p1744_p13 = scmp.ne.s32.totalorder %s60_s20, %s1743_s27  ;;  %p1749_p1 = scmp.lt.s32.totalorder %s1743_s27, %s1743_s27 }
  0x3f   :  { %p1750_p2 = por %p1749_p1, %p1748_p0 }
  0x41   :  { %p1751_p3 = pnand %p1750_p2, %p1744_p13 }
  0x43   :  { %1754 = shalt.err (!%p1751_p3)
}
  0x44   :  { %65 = dma.hbm_to_vmem [thread:$0]  %s1941_s5, 8192, %s60_s20, [#allocation10], %s1786_s11, %s1786_s11, %s1787_s12  }
  0x45   :  { %1777 = dma.done.wait [#allocation4], 128  }
  0x46   :  { %1778 = vsyncadd [#allocation4], 4294967168 }
  0x47   :  { %1779 = dma.done.wait [#allocation7], 10240  }
  0x48   :  { %1780 = vsyncadd [#allocation7], 4294957056 }
  0x49   :  { %1781 = dma.done.wait [#allocation10], 8192  }
  0x4a   :  { %1782 = vsyncadd [#allocation10], 4294959104  ;;  %v1793_v0 = vmov 0   ;;  %v1435_v1 = vld [vmem:[#allocation6 + $0x4] ss:$8 sps:$4 sm:$0xff]   ;;  %v85_v17 = vld [vmem:[#allocation3] sm:$0xff] }
  0x4b   :  { %227 = vmatprep.mubr.bf16.mxu0 %v1793_v0  ;;  %v1437_v2 = vld [vmem:[#allocation6] ss:$8 sps:$4 sm:$0xff]   ;;  %195 = vmatprep.subr.bf16.mxu0 %v1435_v1  ;;  %v1438_v3 = vld [vmem:[#allocation6 + $0x14] ss:$8 sps:$4 sm:$0xff]   ;;  %v1440_v4 = vld [vmem:[#allocation6 + $0x10] ss:$8 sps:$4 sm:$0xff]   ;;  %v86_v20 = vpack.c.bf16 %v85_v17, %v85_v17 }
  0x4c   :  { %196 = vmatpush1.bf16.msra.mxu0 %v1437_v2  ;;  %v1441_v5 = vld [vmem:[#allocation6 + $0x24] ss:$8 sps:$4 sm:$0xff]   ;;  %v1443_v6 = vld [vmem:[#allocation6 + $0x20] ss:$8 sps:$4 sm:$0xff]   ;;  %v1444_v7 = vld [vmem:[#allocation6 + $0x34] ss:$8 sps:$4 sm:$0xff]  }
  0x4d   :  { %197 = vmatprep.subr.bf16.mxu0 %v1438_v3  ;;  %v1446_v8 = vld [vmem:[#allocation6 + $0x30] ss:$8 sps:$4 sm:$0xff]   ;;  %v1447_v9 = vld [vmem:[#allocation6 + $0x44] ss:$8 sps:$4 sm:$0xff]   ;;  %v1449_v10 = vld [vmem:[#allocation6 + $0x40] ss:$8 sps:$4 sm:$0xff]  }
  0x4e   :  { %v1450_v11 = vld [vmem:[#allocation6 + $0x54] ss:$8 sps:$4 sm:$0xff]   ;;  %v1452_v12 = vld [vmem:[#allocation6 + $0x50] ss:$8 sps:$4 sm:$0xff]   ;;  %v1453_v13 = vld [vmem:[#allocation6 + $0x64] ss:$8 sps:$4 sm:$0xff]  }
  0x4f   :  { %v1455_v14 = vld [vmem:[#allocation6 + $0x60] ss:$8 sps:$4 sm:$0xff]   ;;  %v1456_v15 = vld [vmem:[#allocation6 + $0x74] ss:$8 sps:$4 sm:$0xff]   ;;  %v1458_v16 = vld [vmem:[#allocation6 + $0x70] ss:$8 sps:$4 sm:$0xff]  }
  0x50   :  { %198 = vmatpush1.bf16.msra.mxu0 %v1440_v4  ;;  %v1461_v18 = vld [vmem:[#allocation8 + $0x4] ss:$16 sps:$4 sm:$0xff]   ;;  %v1459_v19 = vld [vmem:[#allocation8] ss:$16 sps:$4 sm:$0xff]   ;;  %v1509_v51 = vld [vmem:[#allocation8 + $0xc] ss:$16 sps:$4 sm:$0xff]  }
  0x51   :  { %199 = vmatprep.subr.bf16.mxu0 %v1441_v5  ;;  %v1464_v21 = vld [vmem:[#allocation8 + $0x24] ss:$16 sps:$4 sm:$0xff]   ;;  %v1462_v22 = vld [vmem:[#allocation8 + $0x20] ss:$16 sps:$4 sm:$0xff]   ;;  %v105_v5 = vlaneseq  ;;  %s1794_s29 = smov [#allocation11]  }
  0x52   :  { %v1467_v23 = vld [vmem:[#allocation8 + $0x44] ss:$16 sps:$4 sm:$0xff]   ;;  %v1465_v24 = vld [vmem:[#allocation8 + $0x40] ss:$16 sps:$4 sm:$0xff]   ;;  %s1254_s30 = sshll.u32 %s1794_s29, 4  ;;  %s1255_s30 = int_to_ptr.vmem [resolvable:$true] %s1254_s30 }
  0x53   :  { %v1470_v25 = vld [vmem:[#allocation8 + $0x64] ss:$16 sps:$4 sm:$0xff]   ;;  %v1468_v26 = vld [vmem:[#allocation8 + $0x60] ss:$16 sps:$4 sm:$0xff]   ;;  %p1760_p5 = scmp.lt.s32.totalorder %s1255_s30, %s1255_s30 }
  0x54   :  { %200 = vmatpush1.bf16.msra.mxu0 %v1443_v6  ;;  %v1473_v27 = vld [vmem:[#allocation8 + $0x84] ss:$16 sps:$4 sm:$0xff]   ;;  %v1471_v28 = vld [vmem:[#allocation8 + $0x80] ss:$16 sps:$4 sm:$0xff]  }
  0x55   :  { %201 = vmatprep.subr.bf16.mxu0 %v1444_v7  ;;  %v1476_v29 = vld [vmem:[#allocation8 + $0xa4] ss:$16 sps:$4 sm:$0xff]   ;;  %v1474_v30 = vld [vmem:[#allocation8 + $0xa0] ss:$16 sps:$4 sm:$0xff]  }
  0x56   :  { %v1479_v31 = vld [vmem:[#allocation8 + $0xc4] ss:$16 sps:$4 sm:$0xff]   ;;  %v1477_v32 = vld [vmem:[#allocation8 + $0xc0] ss:$16 sps:$4 sm:$0xff]  }
  0x57   :  { %v1482_v33 = vld [vmem:[#allocation8 + $0xe4] ss:$16 sps:$4 sm:$0xff]   ;;  %v1480_v34 = vld [vmem:[#allocation8 + $0xe0] ss:$16 sps:$4 sm:$0xff]  }
  0x58   :  { %202 = vmatpush1.bf16.msra.mxu0 %v1446_v8  ;;  %v1485_v35 = vld [vmem:[#allocation8 + $0x104] ss:$16 sps:$4 sm:$0xff]   ;;  %v1483_v36 = vld [vmem:[#allocation8 + $0x100] ss:$16 sps:$4 sm:$0xff]   ;;  %v1889_v8 = vshrl.u32 %v105_v5, 7 }
  0x59   :  { %203 = vmatprep.subr.bf16.mxu0 %v1447_v9  ;;  %v1488_v37 = vld [vmem:[#allocation8 + $0x124] ss:$16 sps:$4 sm:$0xff]   ;;  %v1486_v38 = vld [vmem:[#allocation8 + $0x120] ss:$16 sps:$4 sm:$0xff]   ;;  %v1909_v5 = vld [vmem:[%s1940_s4] sm:$0xf] }
  0x5a   :  { %v1491_v39 = vld [vmem:[#allocation8 + $0x144] ss:$16 sps:$4 sm:$0xff]   ;;  %v1489_v40 = vld [vmem:[#allocation8 + $0x140] ss:$16 sps:$4 sm:$0xff]  }
  0x5b   :  { %v1494_v41 = vld [vmem:[#allocation8 + $0x164] ss:$16 sps:$4 sm:$0xff]   ;;  %v1492_v42 = vld [vmem:[#allocation8 + $0x160] ss:$16 sps:$4 sm:$0xff]  }
  0x5c   :  { %204 = vmatpush1.bf16.msra.mxu0 %v1449_v10  ;;  %v1497_v43 = vld [vmem:[#allocation8 + $0x184] ss:$16 sps:$4 sm:$0xff]   ;;  %v1495_v44 = vld [vmem:[#allocation8 + $0x180] ss:$16 sps:$4 sm:$0xff]  }
  0x5d   :  { %205 = vmatprep.subr.bf16.mxu0 %v1450_v11  ;;  %v1500_v45 = vld [vmem:[#allocation8 + $0x1a4] ss:$16 sps:$4 sm:$0xff]   ;;  %v1498_v46 = vld [vmem:[#allocation8 + $0x1a0] ss:$16 sps:$4 sm:$0xff]   ;;  %v1892_v11 = vsub.s32 0, %v1889_v8 }
  0x5e   :  { %v1503_v47 = vld [vmem:[#allocation8 + $0x1c4] ss:$16 sps:$4 sm:$0xff]   ;;  %v1501_v48 = vld [vmem:[#allocation8 + $0x1c0] ss:$16 sps:$4 sm:$0xff]  }
  0x5f   :  { %v1506_v49 = vld [vmem:[#allocation8 + $0x1e4] ss:$16 sps:$4 sm:$0xff]   ;;  %v1504_v50 = vld [vmem:[#allocation8 + $0x1e0] ss:$16 sps:$4 sm:$0xff]  }
  0x60   :  { %206 = vmatpush1.bf16.msra.mxu0 %v1452_v12  ;;  %v1555_v52 = vld [vmem:[#allocation9 + $0x4] ss:$8 sps:$4 sm:$0xff]   ;;  %v1557_v53 = vld [vmem:[#allocation9] ss:$8 sps:$4 sm:$0xff]   ;;  %v1558_v54 = vld [vmem:[#allocation9 + $0x14] ss:$8 sps:$4 sm:$0xff]  }
  0x61   :  { %207 = vmatprep.subr.bf16.mxu0 %v1453_v13  ;;  %1162 = vmatprep.subr.bf16.mxu1 %v1555_v52  ;;  %v1560_v55 = vld [vmem:[#allocation9 + $0x10] ss:$8 sps:$4 sm:$0xff]   ;;  %v1561_v56 = vld [vmem:[#allocation9 + $0x24] ss:$8 sps:$4 sm:$0xff]   ;;  %v1563_v57 = vld [vmem:[#allocation9 + $0x20] ss:$8 sps:$4 sm:$0xff]  }
  0x62   :  { %1163 = vmatpush1.bf16.msra.mxu1 %v1557_v53  ;;  %v1564_v58 = vld [vmem:[#allocation9 + $0x34] ss:$8 sps:$4 sm:$0xff]   ;;  %v1566_v59 = vld [vmem:[#allocation9 + $0x30] ss:$8 sps:$4 sm:$0xff]   ;;  %v1567_v60 = vld [vmem:[#allocation9 + $0x44] ss:$8 sps:$4 sm:$0xff]  }
  0x63   :  { %1164 = vmatprep.subr.bf16.mxu1 %v1558_v54  ;;  %v1569_v61 = vld [vmem:[#allocation9 + $0x40] ss:$8 sps:$4 sm:$0xff]   ;;  %v1570_v62 = vld [vmem:[#allocation9 + $0x54] ss:$8 sps:$4 sm:$0xff]   ;;  %v1572_v63 = vld [vmem:[#allocation9 + $0x50] ss:$8 sps:$4 sm:$0xff]  }
  0x64   :  { %208 = vmatpush1.bf16.msra.mxu0 %v1455_v14  ;;  %v1573_v0 = vld [vmem:[#allocation9 + $0x64] ss:$8 sps:$4 sm:$0xff]   ;;  %v1575_v1 = vld [vmem:[#allocation9 + $0x60] ss:$8 sps:$4 sm:$0xff]   ;;  %v1576_v2 = vld [vmem:[#allocation9 + $0x74] ss:$8 sps:$4 sm:$0xff]  }
  0x65   :  { %209 = vmatprep.subr.bf16.mxu0 %v1456_v15  ;;  %v1578_v3 = vld [vmem:[#allocation9 + $0x70] ss:$8 sps:$4 sm:$0xff]   ;;  %v1579_v4 = vld [vmem:[#allocation9 + $0x84] ss:$8 sps:$4 sm:$0xff]   ;;  %v1581_v6 = vld [vmem:[#allocation9 + $0x80] ss:$8 sps:$4 sm:$0xff]  }
  0x66   :  { %1165 = vmatpush1.bf16.msra.mxu1 %v1560_v55  ;;  %v1582_v7 = vld [vmem:[#allocation9 + $0x94] ss:$8 sps:$4 sm:$0xff]   ;;  %v1584_v9 = vld [vmem:[#allocation9 + $0x90] ss:$8 sps:$4 sm:$0xff]   ;;  %v1585_v10 = vld [vmem:[#allocation9 + $0xa4] ss:$8 sps:$4 sm:$0xff]  }
  0x67   :  { %1166 = vmatprep.subr.bf16.mxu1 %v1561_v56  ;;  %v103_v12 = vld [vmem:[%s1938_s2] sm:$0x3]  ;;  %v1898_v13 = vsub.s32 1, %v1889_v8  ;;  %v1587_v14 = vld [vmem:[#allocation9 + $0xa0] ss:$8 sps:$4 sm:$0xff]  }
  0x68   :  { %210 = vmatpush1.bf16.msra.mxu0 %v1458_v16  ;;  %v108_v15 = vrot.slane %v103_v12, %v1892_v11  ;;  %v1548_v52 = vld [vmem:[#allocation8 + $0x1ac] ss:$16 sps:$4 sm:$0xff]   ;;  %v1546_v53 = vld [vmem:[#allocation8 + $0x1a8] ss:$16 sps:$4 sm:$0xff]  }
  0x69   :  { %646 = vmatprep.subr.bf16.mxu0 %v1461_v18  ;;  %v112_v16 = vrot.slane %v103_v12, %v1898_v13  ;;  %v1551_v54 = vld [vmem:[#allocation8 + $0x1cc] ss:$16 sps:$4 sm:$0xff]   ;;  %v1549_v55 = vld [vmem:[#allocation8 + $0x1c8] ss:$16 sps:$4 sm:$0xff]  }
  0x6a   :  { %1167 = vmatpush1.bf16.msra.mxu1 %v1563_v57  ;;  %v1554_v56 = vld [vmem:[#allocation8 + $0x1ec] ss:$16 sps:$4 sm:$0xff]   ;;  %v1552_v57 = vld [vmem:[#allocation8 + $0x1e8] ss:$16 sps:$4 sm:$0xff]  }
  0x6b   :  { %228 = vmatmul.mubr.bf16.vlgmr.msra.gmra.mrb[0].mxu0 %v86_v20  ;;  %1168 = vmatprep.subr.bf16.mxu1 %v1564_v58  ;;  %v1588_v58 = vld [vmem:[#allocation9 + $0xb4] ss:$8 sps:$4 sm:$0xff]  }
  0x6c   :  { %647 = vmatpush1.bf16.msra.mxu0 %v1459_v19 }
  0x6d   :  { %648 = vmatprep.subr.bf16.mxu0 %v1464_v21 }
  0x6e   :  { %1169 = vmatpush1.bf16.msra.mxu1 %v1566_v59  ;;  %v1590_v59 = vld [vmem:[#allocation9 + $0xb0] ss:$8 sps:$4 sm:$0xff]  }
  0x6f   :  { %1170 = vmatprep.subr.bf16.mxu1 %v1567_v60  ;;  %v1591_v60 = vld [vmem:[#allocation9 + $0xc4] ss:$8 sps:$4 sm:$0xff]  }
  0x70   :  { %649 = vmatpush1.bf16.msra.mxu0 %v1462_v22 }
  0x71   :  { %650 = vmatprep.subr.bf16.mxu0 %v1467_v23 }
  0x72   :  { %1171 = vmatpush1.bf16.msra.mxu1 %v1569_v61  ;;  %v1593_v61 = vld [vmem:[#allocation9 + $0xc0] ss:$8 sps:$4 sm:$0xff]  }
  0x73   :  { %1172 = vmatprep.subr.bf16.mxu1 %v1570_v62  ;;  %v1594_v62 = vld [vmem:[#allocation9 + $0xd4] ss:$8 sps:$4 sm:$0xff]  }
  0x74   :  { %651 = vmatpush1.bf16.msra.mxu0 %v1465_v24 }
  0x75   :  { %652 = vmatprep.subr.bf16.mxu0 %v1470_v25  ;;  %v1507_v25 = vld [vmem:[#allocation8 + $0x8] ss:$16 sps:$4 sm:$0xff]  }
  0x76   :  { %1173 = vmatpush1.bf16.msra.mxu1 %v1572_v63  ;;  %v1596_v63 = vld [vmem:[#allocation9 + $0xd0] ss:$8 sps:$4 sm:$0xff]  }
  0x77   :  { %1174 = vmatprep.subr.bf16.mxu1 %v1573_v0  ;;  %v1597_v0 = vld [vmem:[#allocation9 + $0xe4] ss:$8 sps:$4 sm:$0xff]  }
  0x78   :  { %653 = vmatpush1.bf16.msra.mxu0 %v1468_v26 }
  0x79   :  { %654 = vmatprep.subr.bf16.mxu0 %v1473_v27  ;;  %v1512_v27 = vld [vmem:[#allocation8 + $0x2c] ss:$16 sps:$4 sm:$0xff]  }
  0x7a   :  { %1175 = vmatpush1.bf16.msra.mxu1 %v1575_v1  ;;  %v1599_v1 = vld [vmem:[#allocation9 + $0xe0] ss:$8 sps:$4 sm:$0xff]  }
  0x7b   :  { %1176 = vmatprep.subr.bf16.mxu1 %v1576_v2  ;;  %v1600_v2 = vld [vmem:[#allocation9 + $0xf4] ss:$8 sps:$4 sm:$0xff]  }
  0x7c   :  { %655 = vmatpush1.bf16.msra.mxu0 %v1471_v28 }
  0x7d   :  { %656 = vmatprep.subr.bf16.mxu0 %v1476_v29  ;;  %v1510_v29 = vld [vmem:[#allocation8 + $0x28] ss:$16 sps:$4 sm:$0xff]  }
  0x7e   :  { %1177 = vmatpush1.bf16.msra.mxu1 %v1578_v3  ;;  %v1602_v3 = vld [vmem:[#allocation9 + $0xf0] ss:$8 sps:$4 sm:$0xff]  }
  0x7f   :  { %1178 = vmatprep.subr.bf16.mxu1 %v1579_v4  ;;  %v1605_v4 = vld [vmem:[#allocation9 + $0x104] ss:$8 sps:$4 sm:$0xff]  }
  0x80   :  { %657 = vmatpush1.bf16.msra.mxu0 %v1474_v30  ;;  %v1515_v30 = vld [vmem:[#allocation8 + $0x4c] ss:$16 sps:$4 sm:$0xff]  }
  0x81   :  { %658 = vmatprep.subr.bf16.mxu0 %v1479_v31  ;;  %v1513_v31 = vld [vmem:[#allocation8 + $0x48] ss:$16 sps:$4 sm:$0xff]  }
  0x82   :  { %1179 = vmatpush1.bf16.msra.mxu1 %v1581_v6  ;;  %v309_v6 = vrot.slane %v1909_v5, %v1892_v11 }
  0x83   :  { %1180 = vmatprep.subr.bf16.mxu1 %v1582_v7  ;;  %v313_v7 = vrot.slane %v1909_v5, %v1898_v13 }
  0x84   :  { %659 = vmatpush1.bf16.msra.mxu0 %v1477_v32  ;;  %v1518_v32 = vld [vmem:[#allocation8 + $0x6c] ss:$16 sps:$4 sm:$0xff]  }
  0x85   :  { %660 = vmatprep.subr.bf16.mxu0 %v1482_v33  ;;  %v1516_v33 = vld [vmem:[#allocation8 + $0x68] ss:$16 sps:$4 sm:$0xff]  }
  0x86   :  { %1181 = vmatpush1.bf16.msra.mxu1 %v1584_v9 }
  0x87   :  { %1182 = vmatprep.subr.bf16.mxu1 %v1585_v10 }
  0x88   :  { %661 = vmatpush1.bf16.msra.mxu0 %v1480_v34  ;;  %v1521_v34 = vld [vmem:[#allocation8 + $0x8c] ss:$16 sps:$4 sm:$0xff]  }
  0x89   :  { %662 = vmatprep.subr.bf16.mxu0 %v1485_v35  ;;  %v1519_v35 = vld [vmem:[#allocation8 + $0x88] ss:$16 sps:$4 sm:$0xff]  }
  0x8a   :  { %1183 = vmatpush1.bf16.msra.mxu1 %v1587_v14 }
  0x8b   :  { %1184 = vmatprep.subr.bf16.mxu1 %v1588_v58 }
  0x8c   :  { %663 = vmatpush1.bf16.msra.mxu0 %v1483_v36  ;;  %v1524_v36 = vld [vmem:[#allocation8 + $0xac] ss:$16 sps:$4 sm:$0xff]  }
  0x8d   :  { %664 = vmatprep.subr.bf16.mxu0 %v1488_v37  ;;  %v1522_v37 = vld [vmem:[#allocation8 + $0xa8] ss:$16 sps:$4 sm:$0xff]  }
  0x8e   :  { %1185 = vmatpush1.bf16.msra.mxu1 %v1590_v59 }
  0x8f   :  { %1186 = vmatprep.subr.bf16.mxu1 %v1591_v60  ;;  %v1642_v60 = vld [vmem:[#allocation9 + $0x1d0] ss:$8 sps:$4 sm:$0xff]  }
  0x90   :  { %665 = vmatpush1.bf16.msra.mxu0 %v1486_v38  ;;  %v1527_v38 = vld [vmem:[#allocation8 + $0xcc] ss:$16 sps:$4 sm:$0xff]  }
  0x91   :  { %666 = vmatprep.subr.bf16.mxu0 %v1491_v39  ;;  %v1525_v39 = vld [vmem:[#allocation8 + $0xc8] ss:$16 sps:$4 sm:$0xff]  }
  0x92   :  { %1187 = vmatpush1.bf16.msra.mxu1 %v1593_v61  ;;  %v1647_v61 = vld [vmem:[#allocation9 + $0x1e4] ss:$8 sps:$4 sm:$0xff]  }
  0x93   :  { %1188 = vmatprep.subr.bf16.mxu1 %v1594_v62  ;;  %v1645_v62 = vld [vmem:[#allocation9 + $0x1e0] ss:$8 sps:$4 sm:$0xff]  }
  0x94   :  { %667 = vmatpush1.bf16.msra.mxu0 %v1489_v40  ;;  %v1530_v40 = vld [vmem:[#allocation8 + $0xec] ss:$16 sps:$4 sm:$0xff]  }
  0x95   :  { %668 = vmatprep.subr.bf16.mxu0 %v1494_v41  ;;  %v1528_v41 = vld [vmem:[#allocation8 + $0xe8] ss:$16 sps:$4 sm:$0xff]  }
  0x96   :  { %1189 = vmatpush1.bf16.msra.mxu1 %v1596_v63  ;;  %v1650_v63 = vld [vmem:[#allocation9 + $0x1f4] ss:$8 sps:$4 sm:$0xff]  }
  0x97   :  { %1190 = vmatprep.subr.bf16.mxu1 %v1597_v0  ;;  %v1648_v0 = vld [vmem:[#allocation9 + $0x1f0] ss:$8 sps:$4 sm:$0xff]  }
  0x98   :  { %669 = vmatpush1.bf16.msra.mxu0 %v1492_v42  ;;  %v1533_v42 = vld [vmem:[#allocation8 + $0x10c] ss:$16 sps:$4 sm:$0xff]  }
  0x99   :  { %670 = vmatprep.subr.bf16.mxu0 %v1497_v43  ;;  %v1531_v43 = vld [vmem:[#allocation8 + $0x108] ss:$16 sps:$4 sm:$0xff]  }
  0x9a   :  { %1191 = vmatpush1.bf16.msra.mxu1 %v1599_v1 }
  0x9b   :  { %1192 = vmatprep.subr.bf16.mxu1 %v1600_v2 }
  0x9c   :  { %671 = vmatpush1.bf16.msra.mxu0 %v1495_v44  ;;  %v1536_v44 = vld [vmem:[#allocation8 + $0x12c] ss:$16 sps:$4 sm:$0xff]  }
  0x9d   :  { %672 = vmatprep.subr.bf16.mxu0 %v1500_v45  ;;  %v1534_v45 = vld [vmem:[#allocation8 + $0x128] ss:$16 sps:$4 sm:$0xff]  }
  0x9e   :  { %1193 = vmatpush1.bf16.msra.mxu1 %v1602_v3 }
  0x9f   :  { %1203 = vmatprep.subr.bf16.mxu1 %v1605_v4 }
  0xa0   :  { %673 = vmatpush1.bf16.msra.mxu0 %v1498_v46  ;;  %v1539_v46 = vld [vmem:[#allocation8 + $0x14c] ss:$16 sps:$4 sm:$0xff]  }
  0xa1   :  { %674 = vmatprep.subr.bf16.mxu0 %v1503_v47  ;;  %v1537_v47 = vld [vmem:[#allocation8 + $0x148] ss:$16 sps:$4 sm:$0xff]  }
  0xa4   :  { %675 = vmatpush1.bf16.msra.mxu0 %v1501_v48  ;;  %v1542_v48 = vld [vmem:[#allocation8 + $0x16c] ss:$16 sps:$4 sm:$0xff]  }
  0xa5   :  { %676 = vmatprep.subr.bf16.mxu0 %v1506_v49  ;;  %v1540_v49 = vld [vmem:[#allocation8 + $0x168] ss:$16 sps:$4 sm:$0xff]  }
  0xa8   :  { %677 = vmatpush1.bf16.msra.mxu0 %v1504_v50  ;;  %v1545_v50 = vld [vmem:[#allocation8 + $0x18c] ss:$16 sps:$4 sm:$0xff]  }
  0xa9   :  { %687 = vmatprep.subr.bf16.mxu0 %v1509_v51  ;;  %v1543_v51 = vld [vmem:[#allocation8 + $0x188] ss:$16 sps:$4 sm:$0xff]  }
 0x13e   :  { %v229_v17 = vpop.f32.mrb[0].mxu0 }
 0x13f   :  { %v230_v18 = vadd.f32 %v229_v17, %v108_v15  ;;  %v231_v19 = vpop.f32.mrb[1].mxu0 }
 0x140   :  { %v232_v20 = vadd.f32 %v231_v19, %v112_v16  ;;  %v233_v21 = vpop.f32.mrb[2].mxu0 }
 0x141   :  { %v236_v22 = vpack.c.bf16 %v230_v18, %v230_v18  ;;  %v234_v23 = vpop.f32.mrb[3].mxu0 }
 0x142   :  { %v237_v24 = vpack.c.bf16 %v232_v20, %v232_v20 }
 0x144   :  { %1651 = vtanh.bf16 %v237_v24  ;;  %v1608_v24 = vld [vmem:[#allocation9 + $0x114] ss:$8 sps:$4 sm:$0xff]  }
 0x145   :  { %1653 = vtanh.bf16 %v236_v22  ;;  %v1603_v22 = vld [vmem:[#allocation9 + $0x100] ss:$8 sps:$4 sm:$0xff]  }
 0x14f   :  { %v1652_v26 = vpop.eup %1651 }
 0x150   :  { %v1902_v28 = vpop.eup %1653  ;;  %678 = vmatprep.mubr.bf16.mxu0 %v1652_v26 }
 0x151   :  { %679 = vmatmul.mubr.bf16.vlgmr.msra.gmra.mrb[4].mxu0 %v1902_v28 }
 0x152   :  { %688 = vmatpush1.bf16.msra.mxu0 %v1507_v25  ;;  %719 = vmatprep.mubr.bf16.mxu0 %v1652_v26  ;;  %v1606_v25 = vld [vmem:[#allocation9 + $0x110] ss:$8 sps:$4 sm:$0xff]   ;;  %v1611_v26 = vld [vmem:[#allocation9 + $0x124] ss:$8 sps:$4 sm:$0xff]  }
 0x153   :  { %689 = vmatprep.subr.bf16.mxu0 %v1512_v27  ;;  %v1609_v27 = vld [vmem:[#allocation9 + $0x120] ss:$8 sps:$4 sm:$0xff]  }
 0x156   :  { %690 = vmatpush1.bf16.msra.mxu0 %v1510_v29  ;;  %v1612_v29 = vld [vmem:[#allocation9 + $0x130] ss:$8 sps:$4 sm:$0xff]  }
 0x157   :  { %691 = vmatprep.subr.bf16.mxu0 %v1515_v30  ;;  %v1617_v30 = vld [vmem:[#allocation9 + $0x144] ss:$8 sps:$4 sm:$0xff]  }
 0x15a   :  { %692 = vmatpush1.bf16.msra.mxu0 %v1513_v31  ;;  %v1615_v31 = vld [vmem:[#allocation9 + $0x140] ss:$8 sps:$4 sm:$0xff]  }
 0x15b   :  { %693 = vmatprep.subr.bf16.mxu0 %v1518_v32  ;;  %v1620_v32 = vld [vmem:[#allocation9 + $0x154] ss:$8 sps:$4 sm:$0xff]  }
 0x15e   :  { %694 = vmatpush1.bf16.msra.mxu0 %v1516_v33  ;;  %v1618_v33 = vld [vmem:[#allocation9 + $0x150] ss:$8 sps:$4 sm:$0xff]  }
 0x15f   :  { %695 = vmatprep.subr.bf16.mxu0 %v1521_v34  ;;  %v1623_v34 = vld [vmem:[#allocation9 + $0x164] ss:$8 sps:$4 sm:$0xff]  }
 0x162   :  { %696 = vmatpush1.bf16.msra.mxu0 %v1519_v35  ;;  %v1621_v35 = vld [vmem:[#allocation9 + $0x160] ss:$8 sps:$4 sm:$0xff]  }
 0x163   :  { %697 = vmatprep.subr.bf16.mxu0 %v1524_v36  ;;  %v1626_v36 = vld [vmem:[#allocation9 + $0x174] ss:$8 sps:$4 sm:$0xff]  }
 0x166   :  { %698 = vmatpush1.bf16.msra.mxu0 %v1522_v37  ;;  %v1624_v37 = vld [vmem:[#allocation9 + $0x170] ss:$8 sps:$4 sm:$0xff]  }
 0x167   :  { %699 = vmatprep.subr.bf16.mxu0 %v1527_v38  ;;  %v1629_v38 = vld [vmem:[#allocation9 + $0x184] ss:$8 sps:$4 sm:$0xff]  }
 0x16a   :  { %700 = vmatpush1.bf16.msra.mxu0 %v1525_v39  ;;  %v1627_v39 = vld [vmem:[#allocation9 + $0x180] ss:$8 sps:$4 sm:$0xff]  }
 0x16b   :  { %701 = vmatprep.subr.bf16.mxu0 %v1530_v40  ;;  %v1632_v40 = vld [vmem:[#allocation9 + $0x194] ss:$8 sps:$4 sm:$0xff]  }
 0x16e   :  { %702 = vmatpush1.bf16.msra.mxu0 %v1528_v41  ;;  %v1630_v41 = vld [vmem:[#allocation9 + $0x190] ss:$8 sps:$4 sm:$0xff]  }
 0x16f   :  { %703 = vmatprep.subr.bf16.mxu0 %v1533_v42  ;;  %v1635_v42 = vld [vmem:[#allocation9 + $0x1a4] ss:$8 sps:$4 sm:$0xff]  }
 0x172   :  { %704 = vmatpush1.bf16.msra.mxu0 %v1531_v43  ;;  %v316_v43 = vsub.s32 2, %v1889_v8 }
 0x173   :  { %705 = vmatprep.subr.bf16.mxu0 %v1536_v44  ;;  %v1633_v44 = vld [vmem:[#allocation9 + $0x1a0] ss:$8 sps:$4 sm:$0xff]  }
 0x176   :  { %706 = vmatpush1.bf16.msra.mxu0 %v1534_v45  ;;  %v320_v45 = vsub.s32 3, %v1889_v8  ;;  %v1644_v8 = vld [vmem:[#allocation9 + $0x1d4] ss:$8 sps:$4 sm:$0xff]  }
 0x177   :  { %707 = vmatprep.subr.bf16.mxu0 %v1539_v46  ;;  %v1638_v46 = vld [vmem:[#allocation9 + $0x1b4] ss:$8 sps:$4 sm:$0xff]  }
 0x17a   :  { %708 = vmatpush1.bf16.msra.mxu0 %v1537_v47  ;;  %v317_v47 = vrot.slane %v1909_v5, %v316_v43 }
 0x17b   :  { %709 = vmatprep.subr.bf16.mxu0 %v1542_v48  ;;  %v321_v48 = vrot.slane %v1909_v5, %v320_v45  ;;  %v816_v5 = vld [vmem:[%s1942_s6] sm:$0x3]  ;;  %s1755_s6 = scalar_lea.vmem %s1255_s30, 256 }
 0x17c   :  { %p1756_p4 = scmp.ne.s32.totalorder %s1255_s30, %s1755_s6  ;;  %p1761_p6 = scmp.lt.s32.totalorder %s1755_s6, %s1755_s6 }
 0x17e   :  { %710 = vmatpush1.bf16.msra.mxu0 %v1540_v49  ;;  %v1636_v49 = vld [vmem:[#allocation9 + $0x1b0] ss:$8 sps:$4 sm:$0xff]   ;;  %p1762_p7 = por %p1761_p6, %p1760_p5 }
 0x17f   :  { %711 = vmatprep.subr.bf16.mxu0 %v1545_v50  ;;  %v1641_v50 = vld [vmem:[#allocation9 + $0x1c4] ss:$8 sps:$4 sm:$0xff]  }
 0x180   :  { %p1763_p8 = pnand %p1762_p7, %p1756_p4 }
 0x182   :  { %712 = vmatpush1.bf16.msra.mxu0 %v1543_v51 }
 0x183   :  { %713 = vmatprep.subr.bf16.mxu0 %v1548_v52 }
 0x186   :  { %714 = vmatpush1.bf16.msra.mxu0 %v1546_v53 }
 0x187   :  { %715 = vmatprep.subr.bf16.mxu0 %v1551_v54 }
 0x18a   :  { %716 = vmatpush1.bf16.msra.mxu0 %v1549_v55 }
 0x18b   :  { %717 = vmatprep.subr.bf16.mxu0 %v1554_v56  ;;  %v1639_v56 = vld [vmem:[#allocation9 + $0x1c0] ss:$8 sps:$4 sm:$0xff]  }
 0x18e   :  { %718 = vmatpush1.bf16.msra.mxu0 %v1552_v57 }
 0x191   :  { %720 = vmatmul.mubr.bf16.vlgmr.msra.gmra.mrb[8].mxu0 %v1902_v28  ;;  %v1614_v28 = vld [vmem:[#allocation9 + $0x134] ss:$8 sps:$4 sm:$0xff]  }
 0x224   :  { %v680_v9 = vpop.f32.mrb[4].mxu0 }
 0x225   :  { %v681_v10 = vadd.f32 %v680_v9, %v309_v6  ;;  %v682_v12 = vpop.f32.mrb[5].mxu0  ;;  %v821_v6 = vrot.slane %v816_v5, %v1892_v11 }
 0x226   :  { %v683_v14 = vadd.f32 %v682_v12, %v313_v7  ;;  %v684_v15 = vpop.f32.mrb[6].mxu0  ;;  %v825_v7 = vrot.slane %v816_v5, %v1898_v13 }
 0x227   :  { %v728_v16 = vpack.c.bf16 %v681_v10, %v681_v10  ;;  %v685_v17 = vpop.f32.mrb[7].mxu0 }
 0x228   :  { %v729_v18 = vpack.c.bf16 %v683_v14, %v683_v14 }
 0x229   :  { %1655 = vtanh.bf16 %v728_v16 }
 0x22a   :  { %1657 = vtanh.bf16 %v729_v18 }
 0x234   :  { %v1656_v19 = vpop.eup %1655 }
 0x235   :  { %v1658_v20 = vpop.eup %1657  ;;  %v1415_v23 = vcombine.low %v1656_v19, %v1656_v19 }
 0x236   :  { %v1416_v21 = vcombine.low %v1658_v20, %v1658_v20 }
 0x238   :  { %1194 = vmatprep.mubr.bf16.mxu1 %v1416_v21 }
 0x239   :  { %1195 = vmatmul.mubr.bf16.vlgmr.msra.gmra.mrb[0].mxu1 %v1415_v23 }
 0x23a   :  { %1204 = vmatpush1.bf16.msra.mxu1 %v1603_v22 }
 0x23b   :  { %1205 = vmatprep.subr.bf16.mxu1 %v1608_v24 }
 0x23e   :  { %1206 = vmatpush1.bf16.msra.mxu1 %v1606_v25 }
 0x23f   :  { %1207 = vmatprep.subr.bf16.mxu1 %v1611_v26 }
 0x242   :  { %1208 = vmatpush1.bf16.msra.mxu1 %v1609_v27 }
 0x243   :  { %1209 = vmatprep.subr.bf16.mxu1 %v1614_v28 }
 0x246   :  { %1210 = vmatpush1.bf16.msra.mxu1 %v1612_v29 }
 0x247   :  { %1211 = vmatprep.subr.bf16.mxu1 %v1617_v30 }
 0x24a   :  { %1212 = vmatpush1.bf16.msra.mxu1 %v1615_v31 }
 0x24b   :  { %1213 = vmatprep.subr.bf16.mxu1 %v1620_v32 }
 0x24e   :  { %1214 = vmatpush1.bf16.msra.mxu1 %v1618_v33 }
 0x24f   :  { %1215 = vmatprep.subr.bf16.mxu1 %v1623_v34 }
 0x252   :  { %1216 = vmatpush1.bf16.msra.mxu1 %v1621_v35 }
 0x253   :  { %1217 = vmatprep.subr.bf16.mxu1 %v1626_v36 }
 0x256   :  { %1218 = vmatpush1.bf16.msra.mxu1 %v1624_v37 }
 0x257   :  { %1219 = vmatprep.subr.bf16.mxu1 %v1629_v38 }
 0x25a   :  { %1220 = vmatpush1.bf16.msra.mxu1 %v1627_v39 }
 0x25b   :  { %1221 = vmatprep.subr.bf16.mxu1 %v1632_v40 }
 0x25e   :  { %1222 = vmatpush1.bf16.msra.mxu1 %v1630_v41 }
 0x25f   :  { %1223 = vmatprep.subr.bf16.mxu1 %v1635_v42 }
 0x262   :  { %1224 = vmatpush1.bf16.msra.mxu1 %v1633_v44 }
 0x263   :  { %1225 = vmatprep.subr.bf16.mxu1 %v1638_v46 }
 0x264   :  { %v721_v51 = vpop.f32.mrb[8].mxu0 }
 0x265   :  { %v722_v52 = vadd.f32 %v721_v51, %v317_v47  ;;  %v723_v53 = vpop.f32.mrb[9].mxu0 }
 0x266   :  { %v724_v54 = vadd.f32 %v723_v53, %v321_v48  ;;  %v725_v55 = vpop.f32.mrb[10].mxu0  ;;  %1226 = vmatpush1.bf16.msra.mxu1 %v1636_v49 }
 0x267   :  { %v730_v57 = vpack.c.bf16 %v722_v52, %v722_v52  ;;  %v726_v58 = vpop.f32.mrb[11].mxu0  ;;  %1227 = vmatprep.subr.bf16.mxu1 %v1641_v50 }
 0x268   :  { %v731_v59 = vpack.c.bf16 %v724_v54, %v724_v54 }
 0x269   :  { %1659 = vtanh.bf16 %v730_v57 }
 0x26a   :  { %1661 = vtanh.bf16 %v731_v59  ;;  %1228 = vmatpush1.bf16.msra.mxu1 %v1639_v56 }
 0x26b   :  { %1229 = vmatprep.subr.bf16.mxu1 %v1644_v8 }
 0x26e   :  { %1230 = vmatpush1.bf16.msra.mxu1 %v1642_v60 }
 0x26f   :  { %1231 = vmatprep.subr.bf16.mxu1 %v1647_v61 }
 0x272   :  { %1232 = vmatpush1.bf16.msra.mxu1 %v1645_v62 }
 0x273   :  { %1233 = vmatprep.subr.bf16.mxu1 %v1650_v63 }
 0x274   :  { %v1660_v1 = vpop.eup %1659 }
 0x275   :  { %v1662_v2 = vpop.eup %1661  ;;  %v1417_v4 = vcombine.low %v1660_v1, %v1660_v1 }
 0x276   :  { %1234 = vmatpush1.bf16.msra.mxu1 %v1648_v0  ;;  %v1418_v3 = vcombine.low %v1662_v2, %v1662_v2 }
 0x278   :  { %1235 = vmatprep.mubr.bf16.mxu1 %v1418_v3 }
 0x279   :  { %1236 = vmatmul.mubr.bf16.vlgmr.msra.gmra.mrb[0].mxu1 %v1417_v4 }
 0x34c   :  { %v1237_v9 = vpop.f32.mrb[0].mxu1 }
 0x34d   :  { %v1419_v10 = vadd.f32 %v1237_v9, %v821_v6  ;;  %v1239_v12 = vpop.f32.mrb[1].mxu1 }
 0x34e   :  { %v1420_v14 = vadd.f32 %v1239_v12, %v825_v7  ;;  %v1241_v15 = vpop.f32.mrb[2].mxu1 }
 0x34f   :  { %1663 = vtanh.f32 %v1419_v10  ;;  %v1242_v16 = vpop.f32.mrb[3].mxu1 }
 0x350   :  { %1665 = vtanh.f32 %v1420_v14 }
 0x359   :  { %v1664_v17 = vpop.eup %1663 }
 0x35a   :  { %v1666_v18 = vpop.eup %1665  ;;  %1246 = vst [vmem:[#allocation11] sm:$0xff] %v1664_v17 }
 0x35b   :  { %1247 = vst [vmem:[#allocation11 + $0x8] sm:$0xff] %v1666_v18 }
 0x35c   :  { %1766 = shalt.err (!%p1763_p8)
}
 0x35d   :  { %s1767_s10 = scalar_lea.hbm %s1943_s7, 256 }
 0x35e   :  { %p1768_p9 = scmp.ne.s32.totalorder %s1943_s7, %s1767_s10  ;;  %p1771_p10 = scmp.lt.u32.totalorder %s1767_s10, %s1943_s7 }
 0x360   :  { %p1773_p11 = pnand %p1771_p10, %p1768_p9 }
 0x362   :  { %1776 = shalt.err (!%p1773_p11)
}
 0x363   :  { %1257 = dma.vmem_to_hbm [thread:$0]  %s1255_s30, 256, %s1943_s7, [#allocation5]  }
 0x364   :  { %1783 = dma.done.wait [#allocation5], 256  }
 0x365   :  { %1784 = vsyncadd [#allocation5], 4294967040 }
 0x366   :  { %1261 = vsyncpa [#allocation4], 1 }
 0x367   :  { %1262 = vsyncpa [#allocation7], 1 }
 0x368   :  { %1263 = vsyncpa [#allocation10], 1 }
 0x369   :  { %1264 = vsyncpa [#allocation5], 1 }

</bundles_post_ra>
